<compile_context>
chip_gen: v7x
topology: tpu7x:2x2x1
jax: 0.10.0
libtpu: 0.0.40
codegen_flags: <defaults>
</compile_context>

<pallas_src>
import math

import jax
import jax.numpy as jnp
from jax import lax
from jax.experimental import pallas as pl
from jax.experimental.pallas import tpu as pltpu


def token_embedding_kernel(x_ref, w_ref, o_ref):
    # x_ref: (1, L, c_in)   full sequence of one batch element (VMEM resident)
    # w_ref: (3*c_in, tN)   packed taps [w_prev ; w_mid ; w_next]
    # o_ref: (1, tL, tN)    output tile
    i = pl.program_id(1)                   # L-tile index
    n_l = pl.num_programs(1)
    L = x_ref.shape[1]
    c_in = x_ref.shape[2]
    tL = o_ref.shape[1]

    start = pl.multiple_of(i * tL, tL)
    x_mid = x_ref[0, pl.ds(start, tL), :]                  # (tL, c_in)

    # Circular neighbours: in-tile roll (XLU) + single-row wrap correction.
    prev_inner = pltpu.roll(x_mid, shift=1, axis=0)        # row t -> x[start+t-1]; row 0 wrong
    next_inner = pltpu.roll(x_mid, shift=tL - 1, axis=0)   # row t -> x[start+t+1]; last row wrong

    prev_idx = jnp.where(i == 0, L - 1, start - 1)         # (start - 1) mod L
    next_idx = jnp.where(i == n_l - 1, 0, start + tL)      # (start + tL) mod L
    prev_row = x_ref[0, pl.ds(prev_idx, 1), :]             # (1, c_in)
    next_row = x_ref[0, pl.ds(next_idx, 1), :]             # (1, c_in)

    row = lax.broadcasted_iota(jnp.int32, (tL, c_in), 0)
    x_prev = jnp.where(row == 0, jnp.broadcast_to(prev_row, (tL, c_in)), prev_inner)
    x_next = jnp.where(row == tL - 1, jnp.broadcast_to(next_row, (tL, c_in)), next_inner)

    # Fused 3-tap conv == one matmul over K = 3*c_in; write straight to output.
    x_cat = jnp.concatenate([x_prev, x_mid, x_next], axis=-1)   # (tL, 3*c_in)
    o_ref[0] = jnp.dot(
        x_cat, w_ref[...], preferred_element_type=jnp.float32
    ).astype(o_ref.dtype)


def _pick_tile(dim, target, align):
    """Largest divisor of `dim` that is <= target and a multiple of `align`
    (falls back to the full dim when dim is small or not align-divisible)."""
    if dim <= target or dim % align != 0:
        return dim
    t = (target // align) * align
    while dim % t != 0:
        t -= align
    return t


def token_embedding(x, weight, *, tile_l=None, tile_n=None, compute_dtype=None):
    """x: (B, L, c_in), weight: (d_model, c_in, 3) -> (B, L, d_model)."""
    B, L, c_in = x.shape
    d_model = weight.shape[0]
    assert weight.shape == (d_model, c_in, 3)
    out_dtype = x.dtype

    # Pack the 3 taps along the contraction axis: rows [0:c) hit x[t-1],
    # rows [c:2c) hit x[t], rows [2c:3c) hit x[t+1].
    w_cat = jnp.transpose(weight, (2, 1, 0)).reshape(3 * c_in, d_model)

    if compute_dtype is not None:          # e.g. jnp.bfloat16 on v6e
        x = x.astype(compute_dtype)
        w_cat = w_cat.astype(compute_dtype)

    tL = tile_l if tile_l is not None else _pick_tile(L, 512, 8)
    tN = tile_n if tile_n is not None else _pick_tile(d_model, 512, 128)
    assert L % tL == 0 and d_model % tN == 0
    n_l, n_n = L // tL, d_model // tN

    in_bpe = jnp.dtype(x.dtype).itemsize
    out_bpe = jnp.dtype(out_dtype).itemsize
    # double-buffered per-step footprint + headroom; clamp to v7x physical VMEM
    per_step = L * c_in * in_bpe + 3 * c_in * tN * in_bpe + tL * tN * out_bpe
    vmem_limit = int(min(64 * 1024 * 1024, max(32 * 1024 * 1024, 4 * per_step)))

    cost = pl.CostEstimate(
        flops=2 * B * L * 3 * c_in * d_model,
        transcendentals=0,
        bytes_accessed=(B * L * c_in * in_bpe
                        + 3 * c_in * d_model * in_bpe
                        + B * L * d_model * out_bpe),
    )

    return pl.pallas_call(
        token_embedding_kernel,
        out_shape=jax.ShapeDtypeStruct((B, L, d_model), out_dtype),
        grid_spec=pltpu.PrefetchScalarGridSpec(
            num_scalar_prefetch=0,
            grid=(B, n_l, n_n),
            in_specs=[
                pl.BlockSpec((1, L, c_in), lambda b, i, j: (b, 0, 0)),
                pl.BlockSpec((3 * c_in, tN), lambda b, i, j: (0, j)),
            ],
            out_specs=pl.BlockSpec((1, tL, tN), lambda b, i, j: (b, i, j)),
        ),
        compiler_params=pltpu.CompilerParams(
            dimension_semantics=("parallel", "parallel", "parallel"),
            vmem_limit_bytes=vmem_limit,
        ),
        cost_estimate=cost,
    )(x, w_cat)


def token_embedding_ref(x, weight):
    """Pure-JAX reference with the PyTorch circular-conv semantics."""
    w0 = jnp.transpose(weight[:, :, 0])
    w1 = jnp.transpose(weight[:, :, 1])
    w2 = jnp.transpose(weight[:, :, 2])
    return jnp.roll(x, 1, axis=1) @ w0 + x @ w1 + jnp.roll(x, -1, axis=1) @ w2


def _make_inputs(key, B, L, c_in, d_model):
    kx, kw = jax.random.split(key)
    x = jax.random.normal(kx, (B, L, c_in), dtype=jnp.float32)
    # kaiming_normal_(mode='fan_in', nonlinearity='leaky_relu'):
    fan_in = c_in * 3
    gain = math.sqrt(2.0 / (1.0 + 0.01 ** 2))
    std = gain / math.sqrt(fan_in)
    weight = std * jax.random.normal(kw, (d_model, c_in, 3), dtype=jnp.float32)
    return x, weight


if __name__ == "__main__":
    k1, k2 = jax.random.split(jax.random.PRNGKey(0))

    # 1) small shapes consistent with the module's forward (x is (B, L, c_in))
    x, w = _make_inputs(k1, B=2, L=8, c_in=4, d_model=32)
    out = jax.block_until_ready(token_embedding(x, w))
    ref = token_embedding_ref(x, w)
    assert out.shape == (2, 8, 32)
    assert jnp.allclose(out, ref, atol=1e-4, rtol=1e-4)

    # 2) exercise the L / d_model tiling path (multiple grid tiles per axis)
    x2, w2 = _make_inputs(k2, B=2, L=256, c_in=8, d_model=256)
    out2 = jax.block_until_ready(token_embedding(x2, w2, tile_l=128, tile_n=128))
    ref2 = token_embedding_ref(x2, w2)
    assert out2.shape == (2, 256, 256)
    assert jnp.allclose(out2, ref2, atol=1e-4, rtol=1e-4)

    print("KERNEL_OK")
</pallas_src>

<mosaic_0001>
module attributes {stable_mosaic.version = 11 : i64} {
  func.func @token_embedding_kernel(%arg0: i32, %arg1: i32, %arg2: i32, %arg3: memref<1x8x4xf32, #tpu.memory_space<vmem>>, %arg4: memref<12x32xf32, #tpu.memory_space<vmem>>, %arg5: memref<1x8x32xf32, #tpu.memory_space<vmem>>) attributes {dimension_semantics = [#tpu.dimension_semantics<parallel>, #tpu.dimension_semantics<parallel>, #tpu.dimension_semantics<parallel>], iteration_bounds = array<i64: 2, 1, 1>, scalar_prefetch = 0 : i64, scratch_operands = 0 : i64, tpu.core_type = #tpu.core_type<tc>, window_params = [{transform_indices = @transform_0, window_bounds = array<i64: 1, 8, 4>}, {transform_indices = @transform_1, window_bounds = array<i64: 12, 32>}, {transform_indices = @transform_2, window_bounds = array<i64: 1, 8, 32>}]} {
    %c8_i32 = arith.constant 8 : i32
    %0 = arith.muli %arg1, %c8_i32 : i32
    %1 = tpu.assume_multiple %0, 8 : i32
    %c0 = arith.constant 0 : index
    %2 = arith.index_cast %1 : i32 to index
    %c0_0 = arith.constant 0 : index
    %3 = vector.load %arg3[%c0, %2, %c0_0] : memref<1x8x4xf32, #tpu.memory_space<vmem>>, vector<1x8x4xf32>
    %4 = vector.shape_cast %3 : vector<1x8x4xf32> to vector<8x4xf32>
    %c1_i32 = arith.constant 1 : i32
    %5 = tpu.dynamic_rotate %4 by %c1_i32 dim 0 : vector<8x4xf32>, i32 -> vector<8x4xf32>
    %c7_i32 = arith.constant 7 : i32
    %6 = tpu.dynamic_rotate %4 by %c7_i32 dim 0 : vector<8x4xf32>, i32 -> vector<8x4xf32>
    %c0_i32 = arith.constant 0 : i32
    %7 = arith.cmpi eq, %arg1, %c0_i32 : i32
    %c1_i32_1 = arith.constant 1 : i32
    %8 = arith.subi %1, %c1_i32_1 : i32
    %c7_i32_2 = arith.constant 7 : i32
    %9 = arith.select %7, %c7_i32_2, %8 : i32
    %c0_i32_3 = arith.constant 0 : i32
    %10 = arith.cmpi eq, %arg1, %c0_i32_3 : i32
    %c8_i32_4 = arith.constant 8 : i32
    %11 = arith.addi %1, %c8_i32_4 : i32
    %c0_i32_5 = arith.constant 0 : i32
    %12 = arith.select %10, %c0_i32_5, %11 : i32
    %c0_6 = arith.constant 0 : index
    %13 = arith.index_cast %9 : i32 to index
    %c0_7 = arith.constant 0 : index
    %14 = vector.load %arg3[%c0_6, %13, %c0_7] : memref<1x8x4xf32, #tpu.memory_space<vmem>>, vector<1x1x4xf32>
    %15 = vector.shape_cast %14 : vector<1x1x4xf32> to vector<1x4xf32>
    %c0_8 = arith.constant 0 : index
    %16 = arith.index_cast %12 : i32 to index
    %c0_9 = arith.constant 0 : index
    %17 = vector.load %arg3[%c0_8, %16, %c0_9] : memref<1x8x4xf32, #tpu.memory_space<vmem>>, vector<1x1x4xf32>
    %18 = vector.shape_cast %17 : vector<1x1x4xf32> to vector<1x4xf32>
    %19 = tpu.iota {dimensions = array<i32: 0>} : vector<8x4xi32>
    %c0_i32_10 = arith.constant 0 : i32
    %20 = vector.broadcast %c0_i32_10 : i32 to vector<8x4xi32>
    %21 = arith.cmpi eq, %19, %20 : vector<8x4xi32>
    %22 = vector.shape_cast %15 : vector<1x4xf32> to vector<1x4xf32>
    %23 = vector.broadcast %22 : vector<1x4xf32> to vector<8x4xf32>
    %24 = arith.select %21, %23, %5 : vector<8x4xi1>, vector<8x4xf32>
    %c7_i32_11 = arith.constant 7 : i32
    %25 = vector.broadcast %c7_i32_11 : i32 to vector<8x4xi32>
    %26 = arith.cmpi eq, %19, %25 : vector<8x4xi32>
    %27 = vector.shape_cast %18 : vector<1x4xf32> to vector<1x4xf32>
    %28 = vector.broadcast %27 : vector<1x4xf32> to vector<8x4xf32>
    %29 = arith.select %26, %28, %6 : vector<8x4xi1>, vector<8x4xf32>
    %30 = tpu.concatenate %24, %4, %29 in 1 : vector<8x4xf32>, vector<8x4xf32>, vector<8x4xf32> -> vector<8x12xf32>
    %c0_12 = arith.constant 0 : index
    %c0_13 = arith.constant 0 : index
    %31 = vector.load %arg4[%c0_12, %c0_13] : memref<12x32xf32, #tpu.memory_space<vmem>>, vector<12x32xf32>
    %cst = arith.constant dense<0.000000e+00> : vector<8x32xf32>
    %32 = tpu.matmul %30, %31, %cst {dimension_numbers = #tpu.dot_dimension_numbers<[1], [0], [0], [1], [0, 0, 1, 1], [], []>} : vector<8x12xf32>, vector<12x32xf32>, vector<8x32xf32> -> vector<8x32xf32>
    %c0_14 = arith.constant 0 : index
    %c0_15 = arith.constant 0 : index
    %c0_16 = arith.constant 0 : index
    %33 = vector.load %arg5[%c0_14, %c0_15, %c0_16] : memref<1x8x32xf32, #tpu.memory_space<vmem>>, vector<1x8x32xf32>
    %34 = vector.shape_cast %33 : vector<1x8x32xf32> to vector<8x32xf32>
    %35 = vector.shape_cast %32 : vector<8x32xf32> to vector<1x8x32xf32>
    tpu.vector_store %arg5[%c0_14, %c0_15, %c0_16], %35 {strides = array<i32>} : memref<1x8x32xf32, #tpu.memory_space<vmem>>, vector<1x8x32xf32>,
    return
  }
  func.func @transform_0(%arg0: i32, %arg1: i32, %arg2: i32) -> (i32, i32, i32) {
    %c0_i32 = arith.constant 0 : i32
    %c0_i32_0 = arith.constant 0 : i32
    %c0_i32_1 = arith.constant 0 : i32
    return %arg0, %c0_i32, %c0_i32_0 : i32, i32, i32
  }
  func.func @transform_1(%arg0: i32, %arg1: i32, %arg2: i32) -> (i32, i32) {
    %c0_i32 = arith.constant 0 : i32
    %c0_i32_0 = arith.constant 0 : i32
    return %c0_i32, %arg2 : i32, i32
  }
  func.func @transform_2(%arg0: i32, %arg1: i32, %arg2: i32) -> (i32, i32, i32) {
    %c0_i32 = arith.constant 0 : i32
    return %arg0, %arg1, %arg2 : i32, i32, i32
  }
}

</mosaic_0001>

<bundles_post_ra>
// kernel: tpu_custom_call.1
= control target key start
LH: loop header
LB: loop body
LE: loop exit
PB: predicated region body
PF: predicated region fallthrough
CT: control target
= control target key end

     0   :  { %7 = vsyncpa [#allocation3], 0  ;;  %s720_s0 = inlined_call_operand.vmem [shape: f32[2,8,4], index: 0, kind: input, shape index: {}]   ;;  %s721_s1 = inlined_call_operand.vmem [shape: f32[12,32], index: 1, kind: input, shape index: {}]   ;;  %s722_s2 = inlined_call_operand.hbm [shape: f32[2,8,32], index: 2, kind: output, shape index: {}]  }
   0x1   :  { %9 = vsyncpa [#allocation3 + $0x1], 0  ;;  %s602_s9 = smov 0   ;;  %s604_s10 = smov 0  }
   0x2   :  { %s606_s11 = smov 0   ;;  %s608_s12 = smov 0  }
   0x3   :  { %s610_s13 = smov 0   ;;  %s612_s14 = smov 0  }
   0x4 LB: > { %s408_s15 = sadd.s32 4294967295, %s578_s14   ;;  %s409_s16 = sadd.s32 4294967294, %s578_s14   ;;  %s578_s14 = sphi %s612_s14, %s15_s14   ;;  %s574_s13 = sphi %s610_s13, %s729_s13   ;;  %s570_s12 = sphi %s608_s12, %s728_s12   ;;  %s566_s11 = sphi %s606_s11, %s727_s11   ;;  %s562_s10 = sphi %s604_s10, %s726_s10   ;;  %s558_s9 = sphi %s602_s9, %s725_s9  }
   0x5   : > { %s34_s17 = sadd.s32 1, %s574_s13  ;;  %s97_s18 = sadd.s32 1, %s566_s11 }
   0x6   : > { %p36_p0 = scmp.ge.s32.totalorder %s34_s17, 2  ;;  %p107_p1 = scmp.ne.s32.totalorder %s566_s11, %s562_s10 }
   0x7   : > { %p108_p2 = scmp.eq.s32.totalorder %s408_s15, 1  ;;  %p113_p3 = scmp.ne.s32.totalorder %s562_s10, %s558_s9 }
   0x8   : > { %s731_s17 = smov (%p36_p0, %s34_s17), 0  ;;  %p114_p5 = scmp.eq.s32.totalorder %s409_s16, 1 }
   0x9   : > { %p642_p4 = por %p108_p2, %p107_p1  ;;  %s90_s20 = ssub.s32 %s574_s13, %s731_s17 }
   0xa   : > { %p413_p6 = scmp.ge.s32.totalorder %s578_s14, 1  ;;  %p95_p7 = scmp.eq.s32.totalorder %s90_s20, 0 }
   0xb   : > { %p649_p8 = por %p114_p5, %p113_p3  ;;  %p146_p9 = scmp.lt.s32.totalorder %s578_s14, 3 }
   0xc   : > { %s655_s22 = scalar_select %p95_p7, %s566_s11, %s97_s18  }
   0xd   : > { %p147_p10 = pnand %p413_p6, %p146_p9 }
   0xe   : > { %p171_p11 = scmp.lt.s32.totalorder (!%p147_p10), %s570_s12, 1  ;;  %v193_v0 = vlaneseq (!%p147_p10)  ;;  %v219_v1 = vld [vmem:[%s721_s1] sm:$0xff] (!%p147_p10)  ;;  %vm225_vm0 = vcmask (!%p147_p10), 1043456   ;;  %v580_v2 = vmov (!%p147_p10), 0.0|0.0   ;;  %v220_v3 = vld [vmem:[%s721_s1 + $0x8] sm:$0xf] (!%p147_p10) }
   0xf   : > { %150 = sbr.rel (%p147_p10) target bundleno = 373 (0x175), region = 28  ;;  %435 = vmatprep.subr.bf16.mxu0 (!%p147_p10), %v580_v2  ;;  %v436_v5 = vpack.c.bf16 (!%p147_p10), %v220_v3, %v219_v1  ;;  %vm581_vm1 = vmmov (!%p147_p10), 1   ;;  %vm582_vm3 = vmmov (!%p147_p10), 0   ;;  %v583_v6 = vmov (!%p147_p10), 0.0   ;;  %s584_s4 = smov (!%p147_p10), 4  }
  0x10   : > { %v194_v4 = vshrl.u32 (!%p147_p10), %v193_v0, 7  ;;  %vm437_vm2 = vmpackc.low (!%p147_p10), %vm225_vm0, %vm581_vm1  ;;  %432 = vmatprep.mubr.msk.f32.mxu0 (!%p147_p10), %vm582_vm3, %v583_v6  ;;  %s585_s5 = smov (!%p147_p10), 8   ;;  %vm215_vm6 = vcmask (!%p147_p10), 31744   ;;  %vm217_vm7 = vcmask (!%p147_p10), 64512   ;;  %vm221_vm8 = vcmask (!%p147_p10), 97280   ;;  %s168_s6 = sand.u32 (!%p147_p10), 1, %s562_s10  }
  0x11   : > { %438 = vmatpush3.bf16.msk.msra.mxu0 (!%p147_p10), %vm437_vm2, %v436_v5  ;;  %s414_s7 = sshll.u32 (!%p147_p10), %s168_s6, 3  ;;  %s422_s8 = sshll.u32 (!%p147_p10), %s570_s12, 7  ;;  %vm299_vm9 = vcmask (!%p147_p10), 261120  }
  0x12   : > { %vm201_vm4 = vcmp.eq.s32.totalorder (!%p147_p10), %v194_v4, 7  ;;  %vm195_vm5 = vcmp.eq.s32.totalorder (!%p147_p10), %v194_v4, 0  ;;  %s170_s15 = scalar_lea.vmem (!%p147_p10), [#allocation2], %s414_s7  ;;  %s673_s23 = scalar_lea.hbm (!%p147_p10), %s722_s2, %s422_s8 }
  0x13   : > { %s317_s16 = sshll.u32 (!%p147_p10), %s170_s15, 4  ;;  %s302_s24 = scalar_lea.sflag (!%p147_p10), [#allocation3], %s168_s6  ;;  %s675_s16 = int_to_ptr.vmem [resolvable:$true] %s317_s16 }
  0x14   : > { %s500_s25 = scalar_lea.vmem (!%p147_p10), %s675_s16, 128 }
  0x15   : > { %p501_p12 = scmp.ne.s32.totalorder (!%p147_p10), %s675_s16, %s500_s25 }
  0x16   : > { %s172_s27 = scalar_select %p171_p11, %s570_s12, 1 }
  0x17   : > { %p502_p13 = pnand %p501_p12, %p642_p4  ;;  %s586_s12 = smov [#allocation2]  }
  0x18   : > { %s415_s28 = sshll.u32 %s172_s27, 3  ;;  %s504_s26 = sshll.u32 %s586_s12, 4  ;;  %s505_s26 = int_to_ptr.vmem [resolvable:$false] %s504_s26 }
  0x19   : > { %s174_s3 = scalar_lea.vmem %s720_s0, %s415_s28  ;;  %p503_p0 = pneg %p502_p13 }
  0x1a   : > { %v181_v7 = vld [vmem:[%s174_s3] sm:$0xff]  ;;  %s506_s27 = scalar_lea.vmem %s505_s26, 256  ;;  %p507_p1 = scmp.lt.s32.totalorder %s675_s16, %s505_s26 }
  0x1b   : > { %v418_v8 = vld [vmem:[%s174_s3] ss:$0 sm:$0xff]  ;;  %v417_v9 = vld [vmem:[%s174_s3 + $0x7] ss:$0 sm:$0xff]  ;;  %208 = vrot.lane.b32.xlu0 %v181_v7, %s584_s4  ;;  %v182_v10 = vrot.slane %v181_v7, 7  ;;  %v183_v11 = vrot.slane %v181_v7, 1  ;;  %p508_p2 = scmp.lt.s32.totalorder %s506_s27, %s500_s25 }
  0x1d   : > { %v206_v12 = vsel %vm201_vm4, %v418_v8, %v183_v11  ;;  %v200_v13 = vsel %vm195_vm5, %v417_v9, %v182_v10  ;;  %p509_p3 = por %p508_p2, %p507_p1 }
  0x1f   : > { %212 = vrot.lane.b32.xlu0 %v206_v12, %s585_s5  ;;  %p510_p5 = pnand %p509_p3, %p503_p0 }
  0x8d   : > { %v209_v14 = vpop.permute.xlu0 %208 }
  0x8e   : > { %v216_v15 = vsel %vm215_vm6, %v200_v13, %v209_v14 }
  0x91   : > { %v213_v16 = vpop.permute.xlu0 %212 }
  0x92   : > { %v218_v17 = vsel %vm217_vm7, %v216_v15, %v213_v16 }
  0x93   : > { %433 = vmatmul.mubr.msk.f32.vlgmr.msra.gmra.mrb[0].mxu0 %vm221_vm8, %v218_v17 }
 0x166   : > { %v295_v18 = vpop.f32.mrb[0].mxu0 }
 0x167   : > { %300 = vst.msk [vmem:[%s170_s15] sm:$0xff] %vm299_vm9, %v295_v18  ;;  %v434_v19 = vpop.f32.mrb[1].mxu0 }
 0x168   : > { %513 = shalt.err (!%p510_p5)
}
 0x169   : > { %s514_s28 = scalar_lea.hbm %s673_s23, 128  ;;  %s518_s3 = scalar_lea.hbm %s722_s2, 256 }
 0x16a   : > { %p515_p6 = scmp.ne.s32.totalorder %s673_s23, %s514_s28  ;;  %p519_p10 = scmp.lt.u32.totalorder %s673_s23, %s722_s2 }
 0x16b   : > { %p520_p11 = scmp.lt.u32.totalorder %s518_s3, %s514_s28  ;;  %p522_p13 = scmp.lt.u32.totalorder %s514_s28, %s673_s23 }
 0x16c   : > { %p516_p7 = pnand %p515_p6, %p642_p4 }
 0x16d   : > { %p521_p12 = por %p520_p11, %p519_p10 }
 0x16e   : > { %p517_p9 = pneg %p516_p7 }
 0x16f   : > { %p523_p0 = por %p522_p13, %p521_p12 }
 0x171   : > { %p524_p1 = pnand %p523_p0, %p517_p9 }
 0x173   : > { %527 = shalt.err (!%p524_p1)
}
 0x174   : > { %439 = dma.vmem_to_hbm [thread:$0]  (%p642_p4), %s675_s16, 128, %s673_s23, %s302_s24  }
 0x175 PF: > { %p445_p2 = scmp.ge.s32.totalorder %s578_s14, 2  ;;  %s329_s6 = sand.u32 1, %s558_s9  }
 0x176   : > { %s330_s7 = scalar_lea.sflag [#allocation3], %s329_s6 }
 0x177   : > { %p442_p3 = pnand %p445_p2, %p649_p8 }
 0x179   : > { %553 = dma.done.wait (!%p442_p3), %s330_s7, 128  }
 0x17a   : > { %555 = vsyncadd (!%p442_p3), %s330_s7, 4294967168  ;;  %s15_s14 = sadd.s32 1, %s578_s14   ;;  %s725_s9 = smov %s562_s10 }
 0x17b   : > { %p12_p5 = scmp.ge.s32.totalorder %s15_s14, 4   ;;  %s726_s10 = smov %s566_s11 }
 0x17c   : > { %s727_s11 = smov %s655_s22  ;;  %s728_s12 = smov %s574_s13 }
 0x17d   : > { %s729_s13 = smov %s731_s17  ;;  %14 = sbr.rel (!%p12_p5) target bundleno = 4 (0x4), region = 69 }
 0x184   :  { %335 = vsyncpa [#allocation3], 1 }
 0x185   :  { %337 = vsyncpa [#allocation3 + $0x1], 1 }

</bundles_post_ra>
